<compile_context>
chip_gen: v7x
topology: tpu7x:2x2x1
jax: 0.10.0
libtpu: 0.0.40
codegen_flags: <defaults>
</compile_context>

<pallas_src>
import jax
import jax.numpy as jnp
from jax.experimental import pallas as pl
from jax.experimental.pallas import tpu as pltpu


def prm_kernel(ul_ref, l_ref, lT_ref, out_ref):
    # ul_ref : (1, C, TQ)  query tile  (channels on sublanes, query pixels on lanes)
    # l_ref  : (1, C, HW)  values      (natural layout)
    # lT_ref : (1, HW, C)  keys        (pre-transposed once in the wrapper)
    # out_ref: (1, C, TQ)
    ul = ul_ref[0]           # (C, TQ)
    l = l_ref[0]             # (C, HW)
    lT = lT_ref[0]           # (HW, C)

    # energy^T[j, i] = sum_c l[c, j] * ul[c, i]   (canonical (HW,C)@(C,TQ) -> no transposes)
    # NOTE: with C small this underutilizes the MXU (K=C); fine for the demo, and it
    # becomes well-shaped at production C (>=128).
    energy_t = jnp.dot(lT, ul, preferred_element_type=jnp.float32)      # (HW, TQ) f32

    # Softmax over keys (axis 0 here == dim=-1 of the reference energy),
    # with normalization deferred past the second matmul.
    e_max = jnp.max(energy_t, axis=0, keepdims=True)                    # (1, TQ)
    p = jnp.exp(energy_t - e_max)                                       # (HW, TQ) f32
    denom = jnp.sum(p, axis=0, keepdims=True)                           # (1, TQ)

    # attentionM_unnorm[c, i] = sum_j l[c, j] * p[j, i]   (canonical (C,HW)@(HW,TQ))
    # Cast p to the input dtype so bf16 inputs get native-rate MXU; f32 accumulation kept.
    attn_m = jnp.dot(l, p.astype(l.dtype), preferred_element_type=jnp.float32)   # (C, TQ)

    inv = pl.reciprocal(denom, approx=True)                             # (1, TQ), EUP
    out_ref[0] = (attn_m * inv + ul.astype(jnp.float32)).astype(out_ref.dtype)


def _pick_tq(hw, budget_bytes=8 * 1024 * 1024):
    """Largest lane-aligned query tile whose (HW, TQ) f32 energy slab fits the budget."""
    for tq in (1024, 512, 256, 128):
        if hw % tq == 0 and hw * tq * 4 <= budget_bytes:
            return tq
    return hw  # untiled fallback


def prm_forward(l_p, ul_p, num_l, *, tq=None):
    """JAX/Pallas equivalent of PRM.forward(l_p, ul_p, num_l)."""
    N, C, H, W = ul_p.shape
    assert num_l == N, "view(num_l, -1, H*W) in the reference requires num_l == batch"
    HW = H * W
    assert HW % 128 == 0, "demo path requires H*W to be a multiple of 128"
    if tq is None:
        tq = _pick_tq(HW)
    assert HW % tq == 0

    ul2 = ul_p.reshape(N, C, HW)          # queries, natural (C, HW) layout
    l2 = l_p.reshape(N, C, HW)            # values,  natural (C, HW) layout
    lT = jnp.swapaxes(l2, 1, 2)           # keys, one small O(N*C*HW) transpose in XLA

    grid = (N, HW // tq)

    out = pl.pallas_call(
        prm_kernel,
        out_shape=jax.ShapeDtypeStruct((N, C, HW), ul_p.dtype),
        grid=grid,
        in_specs=[
            pl.BlockSpec((1, C, tq), lambda n, q: (n, 0, q)),   # ul query tile
            pl.BlockSpec((1, C, HW), lambda n, q: (n, 0, 0)),   # l  (values), resident per batch
            pl.BlockSpec((1, HW, C), lambda n, q: (n, 0, 0)),   # lT (keys),   resident per batch
        ],
        out_specs=pl.BlockSpec((1, C, tq), lambda n, q: (n, 0, q)),
        compiler_params=pltpu.CompilerParams(
            dimension_semantics=("parallel", "parallel"),
            vmem_limit_bytes=48 * 1024 * 1024,
        ),
    )(ul2, l2, lT)

    return out.reshape(N, C, H, W)


if __name__ == "__main__":
    key = jax.random.PRNGKey(0)
    k1, k2 = jax.random.split(key)

    N, C, H, W = 2, 4, 16, 16
    l_p = jax.random.uniform(k1, (N, C, H, W), dtype=jnp.float32)
    ul_p = jax.random.uniform(k2, (N, C, H, W), dtype=jnp.float32)

    # tq=128 so the demo actually exercises the query-tile grid axis (2 tiles per batch).
    out = prm_forward(l_p, ul_p, N, tq=128)
    jax.block_until_ready(out)

    # Pure-JAX reference mirroring the PyTorch forward exactly (including the max-scaling).
    m = jnp.max(l_p)
    q = ul_p.reshape(N, C, H * W).transpose(0, 2, 1)           # (N, HW, C)
    kk = l_p.reshape(N, C, H * W)                              # (N, C, HW)
    energy = jnp.einsum('nic,ncj->nij', q / m, kk / m).astype(jnp.float32) * m * m
    attn = jax.nn.softmax(energy, axis=-1)
    attn_m = jnp.einsum('ncj,nij->nci', kk, attn).reshape(N, C, H, W)
    ref = attn_m + ul_p

    assert out.shape == (N, C, H, W)
    err = float(jnp.max(jnp.abs(out - ref)))
    assert jnp.allclose(out, ref, atol=2e-3, rtol=2e-3), err
    print("KERNEL_OK")
</pallas_src>

<mosaic_0001>
module attributes {stable_mosaic.version = 11 : i64} {
  func.func @prm_kernel(%arg0: i32, %arg1: i32, %arg2: memref<1x4x128xf32, #tpu.memory_space<vmem>>, %arg3: memref<1x4x256xf32, #tpu.memory_space<vmem>>, %arg4: memref<1x256x4xf32, #tpu.memory_space<vmem>>, %arg5: memref<1x4x128xf32, #tpu.memory_space<vmem>>) attributes {dimension_semantics = [#tpu.dimension_semantics<parallel>, #tpu.dimension_semantics<parallel>], iteration_bounds = array<i64: 2, 2>, scalar_prefetch = 0 : i64, scratch_operands = 0 : i64, tpu.core_type = #tpu.core_type<tc>, window_params = [{transform_indices = @transform_0, window_bounds = array<i64: 1, 4, 128>}, {transform_indices = @transform_1, window_bounds = array<i64: 1, 4, 256>}, {transform_indices = @transform_2, window_bounds = array<i64: 1, 256, 4>}, {transform_indices = @transform_3, window_bounds = array<i64: 1, 4, 128>}]} {
    %c0 = arith.constant 0 : index
    %c0_0 = arith.constant 0 : index
    %c0_1 = arith.constant 0 : index
    %0 = vector.load %arg2[%c0, %c0_0, %c0_1] : memref<1x4x128xf32, #tpu.memory_space<vmem>>, vector<1x4x128xf32>
    %1 = vector.shape_cast %0 : vector<1x4x128xf32> to vector<4x128xf32>
    %c0_2 = arith.constant 0 : index
    %c0_3 = arith.constant 0 : index
    %c0_4 = arith.constant 0 : index
    %2 = vector.load %arg3[%c0_2, %c0_3, %c0_4] : memref<1x4x256xf32, #tpu.memory_space<vmem>>, vector<1x4x256xf32>
    %3 = vector.shape_cast %2 : vector<1x4x256xf32> to vector<4x256xf32>
    %c0_5 = arith.constant 0 : index
    %c0_6 = arith.constant 0 : index
    %c0_7 = arith.constant 0 : index
    %4 = vector.load %arg4[%c0_5, %c0_6, %c0_7] : memref<1x256x4xf32, #tpu.memory_space<vmem>>, vector<1x256x4xf32>
    %5 = vector.shape_cast %4 : vector<1x256x4xf32> to vector<256x4xf32>
    %cst = arith.constant dense<0.000000e+00> : vector<256x128xf32>
    %6 = tpu.matmul %5, %1, %cst {dimension_numbers = #tpu.dot_dimension_numbers<[1], [0], [0], [1], [0, 0, 1, 1], [], []>} : vector<256x4xf32>, vector<4x128xf32>, vector<256x128xf32> -> vector<256x128xf32>
    %cst_8 = arith.constant dense<0xFF800000> : vector<128xf32>
    %7 = vector.multi_reduction <maximumf>, %6, %cst_8 [0] : vector<256x128xf32> to vector<128xf32>
    %8 = vector.shape_cast %7 : vector<128xf32> to vector<1x128xf32>
    %9 = vector.broadcast %8 : vector<1x128xf32> to vector<256x128xf32>
    %10 = arith.subf %6, %9 : vector<256x128xf32>
    %11 = math.exp %10 : vector<256x128xf32>
    %cst_9 = arith.constant dense<0.000000e+00> : vector<128xf32>
    %12 = vector.multi_reduction <add>, %11, %cst_9 [0] : vector<256x128xf32> to vector<128xf32>
    %13 = vector.shape_cast %12 : vector<128xf32> to vector<1x128xf32>
    %cst_10 = arith.constant dense<0.000000e+00> : vector<4x128xf32>
    %14 = tpu.matmul %3, %11, %cst_10 {dimension_numbers = #tpu.dot_dimension_numbers<[1], [0], [0], [1], [0, 0, 1, 1], [], []>} : vector<4x256xf32>, vector<256x128xf32>, vector<4x128xf32> -> vector<4x128xf32>
    %15 = tpu.reciprocal %13 {approx = true} : vector<1x128xf32> -> vector<1x128xf32>
    %16 = vector.broadcast %15 : vector<1x128xf32> to vector<4x128xf32>
    %17 = arith.mulf %14, %16 : vector<4x128xf32>
    %18 = arith.addf %17, %1 : vector<4x128xf32>
    %c0_11 = arith.constant 0 : index
    %c0_12 = arith.constant 0 : index
    %c0_13 = arith.constant 0 : index
    %19 = vector.load %arg5[%c0_11, %c0_12, %c0_13] : memref<1x4x128xf32, #tpu.memory_space<vmem>>, vector<1x4x128xf32>
    %20 = vector.shape_cast %19 : vector<1x4x128xf32> to vector<4x128xf32>
    %21 = vector.shape_cast %18 : vector<4x128xf32> to vector<1x4x128xf32>
    tpu.vector_store %arg5[%c0_11, %c0_12, %c0_13], %21 {strides = array<i32>} : memref<1x4x128xf32, #tpu.memory_space<vmem>>, vector<1x4x128xf32>,
    return
  }
  func.func @transform_0(%arg0: i32, %arg1: i32) -> (i32, i32, i32) {
    %c0_i32 = arith.constant 0 : i32
    %c0_i32_0 = arith.constant 0 : i32
    return %arg0, %c0_i32, %arg1 : i32, i32, i32
  }
  func.func @transform_1(%arg0: i32, %arg1: i32) -> (i32, i32, i32) {
    %c0_i32 = arith.constant 0 : i32
    %c0_i32_0 = arith.constant 0 : i32
    %c0_i32_1 = arith.constant 0 : i32
    return %arg0, %c0_i32, %c0_i32_0 : i32, i32, i32
  }
  func.func @transform_2(%arg0: i32, %arg1: i32) -> (i32, i32, i32) {
    %c0_i32 = arith.constant 0 : i32
    %c0_i32_0 = arith.constant 0 : i32
    %c0_i32_1 = arith.constant 0 : i32
    return %arg0, %c0_i32, %c0_i32_0 : i32, i32, i32
  }
  func.func @transform_3(%arg0: i32, %arg1: i32) -> (i32, i32, i32) {
    %c0_i32 = arith.constant 0 : i32
    %c0_i32_0 = arith.constant 0 : i32
    return %arg0, %c0_i32, %arg1 : i32, i32, i32
  }
}

</mosaic_0001>

<bundles_post_ra>
// kernel: tpu_custom_call.1
= control target key start
LH: loop header
LB: loop body
LE: loop exit
PB: predicated region body
PF: predicated region fallthrough
CT: control target
= control target key end

     0   :  { %8 = vsyncpa [#allocation3], 0  ;;  %s1920_s0 = inlined_call_operand.vmem [shape: f32[2,4,256], index: 0, kind: input, shape index: {}]   ;;  %s1921_s1 = inlined_call_operand.vmem [shape: f32[2,4,256], index: 1, kind: input, shape index: {}]   ;;  %s1922_s2 = inlined_call_operand.vmem [shape: f32[2,256,4], index: 2, kind: input, shape index: {}]   ;;  %s1923_s3 = inlined_call_operand.hbm [shape: f32[2,4,256], index: 3, kind: output, shape index: {}]  }
   0x1   :  { %10 = vsyncpa [#allocation3 + $0x1], 0  ;;  %s1416_s12 = smov 0   ;;  %s1418_s13 = smov 0  }
   0x2   :  { %s1420_s14 = smov 0   ;;  %s1422_s15 = smov 0  }
   0x3   :  { %s1424_s16 = smov 0   ;;  %s1426_s17 = smov 0  }
   0x4   :  { %s1428_s18 = smov 0   ;;  %s1430_s19 = smov 0  }
   0x5 LB: > { %s959_s20 = sadd.s32 4294967295, %s1393_s19   ;;  %s960_s21 = sadd.s32 4294967294, %s1393_s19   ;;  %s1393_s19 = sphi %s1430_s19, %s16_s19   ;;  %s1389_s18 = sphi %s1428_s18, %s1932_s18   ;;  %s1385_s17 = sphi %s1426_s17, %s1931_s17   ;;  %s1381_s16 = sphi %s1424_s16, %s1930_s16   ;;  %s1377_s15 = sphi %s1422_s15, %s1929_s15   ;;  %s1373_s14 = sphi %s1420_s14, %s1928_s14   ;;  %s1369_s13 = sphi %s1418_s13, %s1927_s13   ;;  %s1365_s12 = sphi %s1416_s12, %s1926_s12  }
   0x6   : > { %s25_s22 = sadd.s32 1, %s1385_s17  ;;  %s28_s23 = sadd.s32 1, %s1389_s18 }
   0x7   : > { %p26_p0 = scmp.ge.s32.totalorder %s25_s22, 2  ;;  %p127_p1 = scmp.ne.s32.totalorder %s1373_s14, %s1369_s13 }
   0x8   : > { %p128_p2 = scmp.eq.s32.totalorder %s959_s20, 3  ;;  %p133_p5 = scmp.ne.s32.totalorder %s1369_s13, %s1365_s12 }
   0x9   : > { %s1934_s22 = smov (%p26_p0, %s25_s22), 0  ;;  %s1936_s23 = smov (!%p26_p0, %s28_s23), %s1389_s18 }
   0xa   : > { %s113_s24 = ssub.s32 %s1385_s17, %s1934_s22  ;;  %p1467_p3 = por %p128_p2, %p127_p1 }
   0xb   : > { %p30_p4 = scmp.ge.s32.totalorder %s1936_s23, 2  ;;  %p134_p6 = scmp.eq.s32.totalorder %s960_s21, 3 }
   0xc   : > { %p963_p7 = scmp.ge.s32.totalorder %s1393_s19, 1  ;;  %p179_p9 = scmp.lt.s32.totalorder %s1393_s19, 5 }
   0xd   : > { %s1938_s23 = smov (%p30_p4, %s1936_s23), 0  ;;  %p1476_p8 = por %p134_p6, %p133_p5 }
   0xe   : > { %s112_s27 = ssub.s32 %s1389_s18, %s1938_s23  ;;  %s117_s28 = sadd.s32 1, %s1373_s14 }
   0xf   : > { %s114_s29 = sor.u32 %s113_s24, %s112_s27  ;;  %p180_p10 = pnand %p963_p7, %p179_p9 }
  0x10   : > { %p115_p11 = scmp.eq.s32.totalorder %s114_s29, 0  ;;  %p216_p12 = scmp.lt.s32.totalorder (!%p180_p10), %s1381_s16, 1  ;;  %vm268_vm0 = vcmask (!%p180_p10), 31744   ;;  %vm365_vm1 = vcmask (!%p180_p10), 1043456  }
  0x11   : > { %183 = sbr.rel (%p180_p10) target bundleno = 629 (0x275), region = 32  ;;  %p218_p13 = scmp.lt.s32.totalorder (!%p180_p10), %s1377_s15, 1 }
  0x12   : > { %s1485_s30 = scalar_select %p115_p11, %s1373_s14, %s117_s28  }
  0x18   : > { %s1490_s4 = scalar_select %p216_p12, %s1381_s16, 1 }
  0x19   : > { %s219_s5 = scalar_select %p218_p13, %s1377_s15, 1 }
  0x1a   : > { %s965_s6 = sshll.u32 %s1490_s4, 1  ;;  %s1010_s7 = sshll.u32 %s1490_s4, 8 }
  0x1b   : > { %s221_s8 = sadd.s32 %s965_s6, %s219_s5  ;;  %s1498_s11 = scalar_lea.vmem %s1922_s2, %s1010_s7 }
  0x1c   : > { %s966_s20 = sshll.u32 %s221_s8, 2  ;;  %v236_v0 = vld [vmem:[%s1498_s11] sm:$0xff]  ;;  %v237_v2 = vld [vmem:[%s1498_s11 + $0x8] sm:$0xff]  ;;  %v238_v3 = vld [vmem:[%s1498_s11 + $0x10] sm:$0xff]  ;;  %s1009_s28 = sshll.u32 %s1490_s4, 3 }
  0x1d   : > { %s223_s27 = scalar_lea.vmem %s1920_s0, %s966_s20  ;;  %1081 = vmatprep.mubr.msk.f32.mxu0 %vm268_vm0, %v236_v0  ;;  %v239_v4 = vld [vmem:[%s1498_s11 + $0x18] sm:$0xff]  ;;  %v240_v5 = vld [vmem:[%s1498_s11 + $0x20] sm:$0xff]  ;;  %v241_v6 = vld [vmem:[%s1498_s11 + $0x28] sm:$0xff]  ;;  %s228_s6 = scalar_lea.vmem %s1921_s1, %s1009_s28 }
  0x1e   : > { %v1505_v1 = vld [vmem:[%s223_s27] sm:$0xf]  ;;  %v242_v7 = vld [vmem:[%s1498_s11 + $0x30] sm:$0xff]  ;;  %v243_v8 = vld [vmem:[%s1498_s11 + $0x38] sm:$0xff]  ;;  %s213_s4 = sand.u32 1, %s1369_s13   ;;  %s1005_s8 = sshll.u32 %s1381_s16, 1 }
  0x1f   : > { %1079 = vmatprep.subr.msk.mxu0 %vm365_vm1, %v1505_v1  ;;  %v244_v9 = vld [vmem:[%s1498_s11 + $0x40] sm:$0xff]  ;;  %v245_v10 = vld [vmem:[%s1498_s11 + $0x48] sm:$0xff]  ;;  %v246_v11 = vld [vmem:[%s1498_s11 + $0x50] sm:$0xff]  ;;  %s964_s7 = sshll.u32 %s213_s4, 2  ;;  %s853_s9 = sadd.s32 %s1377_s15, %s1005_s8 }
  0x20   : > { %1080 = vmatpush3.msk.msra.mxu0 %vm365_vm1, %v1505_v1  ;;  %v247_v12 = vld [vmem:[%s1498_s11 + $0x58] sm:$0xff]  ;;  %v248_v13 = vld [vmem:[%s1498_s11 + $0x60] sm:$0xff]  ;;  %v249_v14 = vld [vmem:[%s1498_s11 + $0x68] sm:$0xff]  ;;  %s1006_s10 = sshll.u32 %s853_s9, 6  ;;  %s842_s15 = scalar_lea.sflag [#allocation3], %s213_s4 }
  0x21   : > { %1082 = vmatmul.mubr.msk.f32.vlgmr.msra.gmra.mrb[0].mxu0 %vm268_vm0, %v237_v2  ;;  %v250_v15 = vld [vmem:[%s1498_s11 + $0x70] sm:$0xff]  ;;  %v251_v16 = vld [vmem:[%s1498_s11 + $0x78] sm:$0xff]  ;;  %v252_v17 = vld [vmem:[%s1498_s11 + $0x80] sm:$0xff]  ;;  %s1867_s27 = scalar_lea.hbm %s1923_s3, %s1006_s10  ;;  %s1395_s28 = smov [#allocation2]  }
  0x22   : > { %1084 = vmatprep.mubr.msk.f32.mxu0 %vm268_vm0, %v238_v3  ;;  %v253_v18 = vld [vmem:[%s1498_s11 + $0x88] sm:$0xff]  ;;  %v254_v19 = vld [vmem:[%s1498_s11 + $0x90] sm:$0xff]  ;;  %v255_v20 = vld [vmem:[%s1498_s11 + $0x98] sm:$0xff]  ;;  %s1303_s29 = sshll.u32 %s1395_s28, 4  ;;  %s1304_s29 = int_to_ptr.vmem [resolvable:$false] %s1303_s29 }
  0x23   : > { %v256_v21 = vld [vmem:[%s1498_s11 + $0xa0] sm:$0xff]  ;;  %v257_v22 = vld [vmem:[%s1498_s11 + $0xa8] sm:$0xff]  ;;  %v258_v23 = vld [vmem:[%s1498_s11 + $0xb0] sm:$0xff]  ;;  %s1305_s5 = scalar_lea.vmem %s1304_s29, 128 }
  0x24   : > { %v259_v24 = vld [vmem:[%s1498_s11 + $0xb8] sm:$0xff]  ;;  %v260_v25 = vld [vmem:[%s1498_s11 + $0xc0] sm:$0xff]  ;;  %v261_v26 = vld [vmem:[%s1498_s11 + $0xc8] sm:$0xff] }
  0x25   : > { %1085 = vmatmul.mubr.msk.f32.gmra.mrb[2].mxu0 %vm268_vm0, %v239_v4  ;;  %v262_v27 = vld [vmem:[%s1498_s11 + $0xd0] sm:$0xff]  ;;  %v263_v28 = vld [vmem:[%s1498_s11 + $0xd8] sm:$0xff]  ;;  %v264_v29 = vld [vmem:[%s1498_s11 + $0xe0] sm:$0xff] }
  0x26   : > { %1087 = vmatprep.mubr.msk.f32.mxu0 %vm268_vm0, %v240_v5  ;;  %v265_v30 = vld [vmem:[%s1498_s11 + $0xe8] sm:$0xff]  ;;  %v266_v31 = vld [vmem:[%s1498_s11 + $0xf0] sm:$0xff]  ;;  %v267_v32 = vld [vmem:[%s1498_s11 + $0xf8] sm:$0xff]  ;;  %s215_s11 = scalar_lea.vmem [#allocation2], %s964_s7 }
  0x27   : > { %v1629_v2 = vld [vmem:[%s228_s6] sm:$0xff]  ;;  %s857_s20 = sshll.u32 %s215_s11, 4  ;;  %s1869_s20 = int_to_ptr.vmem [resolvable:$true] %s857_s20 }
  0x28   : > { %v765_v3 = vcombine.high %v1629_v2, %v1629_v2  ;;  %s1299_s16 = scalar_lea.vmem %s1869_s20, 64  ;;  %p1306_p4 = scmp.lt.s32.totalorder %s1869_s20, %s1304_s29 }
  0x29   : > { %1088 = vmatmul.mubr.msk.f32.gmra.mrb[4].mxu0 %vm268_vm0, %v241_v6  ;;  %p1300_p0 = scmp.ne.s32.totalorder %s1869_s20, %s1299_s16  ;;  %p1307_p5 = scmp.lt.s32.totalorder %s1305_s5, %s1299_s16 }
  0x2a   : > { %1090 = vmatprep.mubr.msk.f32.mxu0 %vm268_vm0, %v242_v7  ;;  %831 = vmatprep.mubr.f32.mxu1 %v765_v3 }
  0x2b   : > { %p1301_p1 = pnand %p1300_p0, %p1467_p3  ;;  %p1308_p6 = por %p1307_p5, %p1306_p4 }
  0x2d   : > { %1091 = vmatmul.mubr.msk.f32.gmra.mrb[6].mxu0 %vm268_vm0, %v243_v8  ;;  %p1302_p2 = pneg %p1301_p1 }
  0x2e   : > { %1093 = vmatprep.mubr.msk.f32.mxu0 %vm268_vm0, %v244_v9 }
  0x2f   : > { %p1309_p7 = pnand %p1308_p6, %p1302_p2 }
  0x31   : > { %1094 = vmatmul.mubr.msk.f32.gmra.mrb[8].mxu0 %vm268_vm0, %v245_v10 }
  0x32   : > { %1096 = vmatprep.mubr.msk.f32.mxu0 %vm268_vm0, %v246_v11 }
  0x35   : > { %1097 = vmatmul.mubr.msk.f32.gmra.mrb[10].mxu0 %vm268_vm0, %v247_v12 }
  0x36   : > { %1099 = vmatprep.mubr.msk.f32.mxu0 %vm268_vm0, %v248_v13 }
  0x39   : > { %1100 = vmatmul.mubr.msk.f32.gmra.mrb[12].mxu0 %vm268_vm0, %v249_v14 }
  0x3a   : > { %1102 = vmatprep.mubr.msk.f32.mxu0 %vm268_vm0, %v250_v15 }
  0x3d   : > { %1103 = vmatmul.mubr.msk.f32.gmra.mrb[14].mxu0 %vm268_vm0, %v251_v16 }
  0x3e   : > { %1105 = vmatprep.mubr.msk.f32.mxu0 %vm268_vm0, %v252_v17 }
  0x41   : > { %1106 = vmatmul.mubr.msk.f32.gmra.mrb[16].mxu0 %vm268_vm0, %v253_v18 }
  0x42   : > { %1108 = vmatprep.mubr.msk.f32.mxu0 %vm268_vm0, %v254_v19 }
  0x45   : > { %1109 = vmatmul.mubr.msk.f32.gmra.mrb[18].mxu0 %vm268_vm0, %v255_v20 }
  0x46   : > { %1111 = vmatprep.mubr.msk.f32.mxu0 %vm268_vm0, %v256_v21 }
  0x49   : > { %1112 = vmatmul.mubr.msk.f32.gmra.mrb[20].mxu0 %vm268_vm0, %v257_v22 }
  0x4a   : > { %1114 = vmatprep.mubr.msk.f32.mxu0 %vm268_vm0, %v258_v23 }
  0x4d   : > { %1115 = vmatmul.mubr.msk.f32.gmra.mrb[22].mxu0 %vm268_vm0, %v259_v24 }
  0x4e   : > { %1117 = vmatprep.mubr.msk.f32.mxu0 %vm268_vm0, %v260_v25 }
  0x51   : > { %1118 = vmatmul.mubr.msk.f32.gmra.mrb[24].mxu0 %vm268_vm0, %v261_v26 }
  0x52   : > { %1120 = vmatprep.mubr.msk.f32.mxu0 %vm268_vm0, %v262_v27 }
  0x55   : > { %1121 = vmatmul.mubr.msk.f32.gmra.mrb[26].mxu0 %vm268_vm0, %v263_v28 }
  0x56   : > { %1123 = vmatprep.mubr.msk.f32.mxu0 %vm268_vm0, %v264_v29 }
  0x59   : > { %1124 = vmatmul.mubr.msk.f32.gmra.mrb[28].mxu0 %vm268_vm0, %v265_v30 }
  0x5a   : > { %1126 = vmatprep.mubr.msk.f32.mxu0 %vm268_vm0, %v266_v31 }
  0x5d   : > { %1127 = vmatmul.mubr.msk.f32.gmra.mrb[30].mxu0 %vm268_vm0, %v267_v32 }
  0xf4   : > { %v1571_v33 = vpop.f32.mrb[0].mxu0 }
  0xf5   : > { %v1573_v34 = vpop.f32.mrb[1].mxu0 }
  0xf8   : > { %v1575_v35 = vpop.f32.mrb[2].mxu0 }
  0xf9   : > { %v1577_v36 = vpop.f32.mrb[3].mxu0 }
  0xfc   : > { %v1579_v37 = vpop.f32.mrb[4].mxu0 }
  0xfd   : > { %v595_v38 = vmax.f32 %v1571_v33, %v1579_v37  ;;  %v1583_v39 = vpop.f32.mrb[5].mxu0 }
  0xfe   : > { %v594_v40 = vmax.f32 %v1573_v34, %v1583_v39 }
 0x100   : > { %v1587_v41 = vpop.f32.mrb[6].mxu0 }
 0x101   : > { %v597_v42 = vmax.f32 %v1575_v35, %v1587_v41  ;;  %v1591_v43 = vpop.f32.mrb[7].mxu0 }
 0x102   : > { %v596_v44 = vmax.f32 %v1577_v36, %v1591_v43 }
 0x104   : > { %v1595_v45 = vpop.f32.mrb[8].mxu0 }
 0x105   : > { %v599_v46 = vmax.f32 %v595_v38, %v1595_v45  ;;  %v1598_v47 = vpop.f32.mrb[9].mxu0 }
 0x106   : > { %v598_v48 = vmax.f32 %v594_v40, %v1598_v47 }
 0x108   : > { %v1601_v49 = vpop.f32.mrb[10].mxu0 }
 0x109   : > { %v601_v50 = vmax.f32 %v597_v42, %v1601_v49  ;;  %v1604_v51 = vpop.f32.mrb[11].mxu0 }
 0x10a   : > { %v600_v52 = vmax.f32 %v596_v44, %v1604_v51 }
 0x10c   : > { %v1607_v53 = vpop.f32.mrb[12].mxu0 }
 0x10d   : > { %v603_v54 = vmax.f32 %v599_v46, %v1607_v53  ;;  %v1610_v55 = vpop.f32.mrb[13].mxu0 }
 0x10e   : > { %v602_v56 = vmax.f32 %v598_v48, %v1610_v55 }
 0x110   : > { %v1613_v57 = vpop.f32.mrb[14].mxu0 }
 0x111   : > { %v605_v58 = vmax.f32 %v601_v50, %v1613_v57  ;;  %v1616_v59 = vpop.f32.mrb[15].mxu0 }
 0x112   : > { %v604_v60 = vmax.f32 %v600_v52, %v1616_v59 }
 0x114   : > { %v1619_v61 = vpop.f32.mrb[16].mxu0 }
 0x115   : > { %v607_v62 = vmax.f32 %v603_v54, %v1619_v61  ;;  %v1623_v63 = vpop.f32.mrb[17].mxu0 }
 0x116   : > { %v606_v0 = vmax.f32 %v602_v56, %v1623_v63 }
 0x118   : > { %v1633_v4 = vpop.f32.mrb[18].mxu0 }
 0x119   : > { %v609_v5 = vmax.f32 %v605_v58, %v1633_v4  ;;  %v1636_v6 = vpop.f32.mrb[19].mxu0 }
 0x11a   : > { %v608_v7 = vmax.f32 %v604_v60, %v1636_v6 }
 0x11c   : > { %v1639_v8 = vpop.f32.mrb[20].mxu0 }
 0x11d   : > { %v611_v9 = vmax.f32 %v607_v62, %v1639_v8  ;;  %v1642_v10 = vpop.f32.mrb[21].mxu0 }
 0x11e   : > { %v610_v11 = vmax.f32 %v606_v0, %v1642_v10 }
 0x120   : > { %v1645_v12 = vpop.f32.mrb[22].mxu0 }
 0x121   : > { %v613_v13 = vmax.f32 %v609_v5, %v1645_v12  ;;  %v1648_v14 = vpop.f32.mrb[23].mxu0 }
 0x122   : > { %v612_v15 = vmax.f32 %v608_v7, %v1648_v14 }
 0x124   : > { %v1651_v16 = vpop.f32.mrb[24].mxu0 }
 0x125   : > { %v615_v17 = vmax.f32 %v611_v9, %v1651_v16  ;;  %v1654_v18 = vpop.f32.mrb[25].mxu0 }
 0x126   : > { %v614_v19 = vmax.f32 %v610_v11, %v1654_v18 }
 0x128   : > { %v1657_v20 = vpop.f32.mrb[26].mxu0 }
 0x129   : > { %v617_v21 = vmax.f32 %v613_v13, %v1657_v20  ;;  %v1660_v22 = vpop.f32.mrb[27].mxu0 }
 0x12a   : > { %v616_v23 = vmax.f32 %v612_v15, %v1660_v22 }
 0x12c   : > { %v1663_v24 = vpop.f32.mrb[28].mxu0 }
 0x12d   : > { %v619_v25 = vmax.f32 %v615_v17, %v1663_v24  ;;  %v1666_v26 = vpop.f32.mrb[29].mxu0 }
 0x12e   : > { %v618_v27 = vmax.f32 %v614_v19, %v1666_v26 }
 0x130   : > { %v622_v28 = vmax.f32 %v618_v27, %v619_v25  ;;  %v1669_v29 = vpop.f32.mrb[30].mxu0 }
 0x131   : > { %v621_v30 = vmax.f32 %v617_v21, %v1669_v29  ;;  %v1672_v31 = vpop.f32.mrb[31].mxu0 }
 0x132   : > { %v620_v32 = vmax.f32 %v616_v23, %v1672_v31 }
 0x134   : > { %v623_v38 = vmax.f32 %v620_v32, %v621_v30 }
 0x136   : > { %v624_v40 = vmax.f32 %v622_v28, %v623_v38 }
 0x138   : > { %v625_v42 = vrot.slane %v624_v40, 4 }
 0x13a   : > { %v626_v44 = vmax.f32 %v624_v40, %v625_v42 }
 0x13c   : > { %v627_v46 = vrot.slane %v626_v44, 2 }
 0x13e   : > { %v628_v48 = vmax.f32 %v626_v44, %v627_v46 }
 0x140   : > { %v629_v50 = vrot.slane %v628_v48, 1 }
 0x142   : > { %v1675_v52 = vmax.f32 %v628_v48, %v629_v50 }
 0x144   : > { %v631_v54 = vsub.f32 %v1573_v34, %v1675_v52  ;;  %v632_v56 = vsub.f32 %v1571_v33, %v1675_v52  ;;  %v633_v58 = vsub.f32 %v1577_v36, %v1675_v52  ;;  %v634_v60 = vsub.f32 %v1575_v35, %v1675_v52 }
 0x145   : > { %v635_v62 = vsub.f32 %v1583_v39, %v1675_v52  ;;  %v636_v0 = vsub.f32 %v1579_v37, %v1675_v52  ;;  %v637_v3 = vsub.f32 %v1591_v43, %v1675_v52  ;;  %v638_v34 = vsub.f32 %v1587_v41, %v1675_v52 }
 0x146   : > { %v639_v33 = vsub.f32 %v1598_v47, %v1675_v52  ;;  %v640_v36 = vsub.f32 %v1595_v45, %v1675_v52  ;;  %v641_v35 = vsub.f32 %v1604_v51, %v1675_v52  ;;  %v642_v39 = vsub.f32 %v1601_v49, %v1675_v52 }
 0x147   : > { %v643_v37 = vsub.f32 %v1610_v55, %v1675_v52  ;;  %v644_v43 = vsub.f32 %v1607_v53, %v1675_v52  ;;  %v645_v41 = vsub.f32 %v1616_v59, %v1675_v52  ;;  %v646_v47 = vsub.f32 %v1613_v57, %v1675_v52 }
 0x148   : > { %v647_v45 = vsub.f32 %v1623_v63, %v1675_v52  ;;  %v648_v51 = vsub.f32 %v1619_v61, %v1675_v52  ;;  %v649_v49 = vsub.f32 %v1636_v6, %v1675_v52  ;;  %v650_v55 = vsub.f32 %v1633_v4, %v1675_v52 }
 0x149   : > { %v651_v53 = vsub.f32 %v1642_v10, %v1675_v52  ;;  %v652_v59 = vsub.f32 %v1639_v8, %v1675_v52  ;;  %v653_v57 = vsub.f32 %v1648_v14, %v1675_v52  ;;  %v654_v63 = vsub.f32 %v1645_v12, %v1675_v52 }
 0x14a   : > { %v655_v61 = vsub.f32 %v1654_v18, %v1675_v52  ;;  %v656_v5 = vsub.f32 %v1651_v16, %v1675_v52  ;;  %v657_v4 = vsub.f32 %v1660_v22, %v1675_v52  ;;  %v658_v6 = vsub.f32 %v1657_v20, %v1675_v52 }
 0x14b   : > { %v659_v7 = vsub.f32 %v1666_v26, %v1675_v52  ;;  %v660_v9 = vsub.f32 %v1663_v24, %v1675_v52  ;;  %v661_v10 = vsub.f32 %v1672_v31, %v1675_v52  ;;  %v662_v11 = vsub.f32 %v1669_v29, %v1675_v52 }
 0x14c   : > { %v663_v13 = vmul.f32 1.442695, %v631_v54  ;;  %v665_v15 = vmul.f32 1.442695, %v632_v56  ;;  %v667_v17 = vmul.f32 1.442695, %v633_v58 }
 0x14d   : > { %v669_v19 = vmul.f32 1.442695, %v634_v60  ;;  %v671_v21 = vmul.f32 1.442695, %v635_v62  ;;  %v673_v23 = vmul.f32 1.442695, %v636_v0 }
 0x14e   : > { %1233 = vpow2.f32 %v663_v13  ;;  %v675_v25 = vmul.f32 1.442695, %v637_v3  ;;  %v677_v27 = vmul.f32 1.442695, %v638_v34  ;;  %v679_v28 = vmul.f32 1.442695, %v639_v33 }
 0x14f   : > { %1235 = vpow2.f32 %v665_v15  ;;  %v681_v30 = vmul.f32 1.442695, %v640_v36  ;;  %v683_v32 = vmul.f32 1.442695, %v641_v35  ;;  %v685_v38 = vmul.f32 1.442695, %v642_v39 }
 0x150   : > { %1237 = vpow2.f32 %v667_v17  ;;  %v687_v40 = vmul.f32 1.442695, %v643_v37  ;;  %v689_v42 = vmul.f32 1.442695, %v644_v43  ;;  %v691_v46 = vmul.f32 1.442695, %v645_v41 }
 0x151   : > { %1239 = vpow2.f32 %v669_v19  ;;  %v693_v50 = vmul.f32 1.442695, %v646_v47  ;;  %v695_v56 = vmul.f32 1.442695, %v647_v45  ;;  %v697_v0 = vmul.f32 1.442695, %v648_v51 }
 0x152   : > { %1241 = vpow2.f32 %v671_v21  ;;  %v699_v34 = vmul.f32 1.442695, %v649_v49  ;;  %v701_v39 = vmul.f32 1.442695, %v650_v55  ;;  %v703_v43 = vmul.f32 1.442695, %v651_v53 }
 0x153   : > { %1243 = vpow2.f32 %v673_v23  ;;  %v705_v51 = vmul.f32 1.442695, %v652_v59  ;;  %v707_v55 = vmul.f32 1.442695, %v653_v57  ;;  %v709_v8 = vmul.f32 1.442695, %v654_v63 }
 0x154   : > { %1245 = vpow2.f32 %v675_v25  ;;  %v711_v14 = vmul.f32 1.442695, %v655_v61  ;;  %v713_v12 = vmul.f32 1.442695, %v656_v5  ;;  %v715_v18 = vmul.f32 1.442695, %v657_v4 }
 0x155   : > { %1247 = vpow2.f32 %v677_v27  ;;  %v717_v16 = vmul.f32 1.442695, %v658_v6  ;;  %v719_v22 = vmul.f32 1.442695, %v659_v7  ;;  %v721_v20 = vmul.f32 1.442695, %v660_v9 }
 0x156   : > { %1249 = vpow2.f32 %v679_v28  ;;  %v723_v28 = vmul.f32 1.442695, %v661_v10 }
 0x157   : > { %1251 = vpow2.f32 %v681_v30 }
 0x158   : > { %v1741_v44 = vpop.eup %1233  ;;  %1253 = vpow2.f32 %v683_v32  ;;  %v725_v32 = vmul.f32 1.442695, %v662_v11 }
 0x159   : > { %v1743_v48 = vpop.eup %1235  ;;  %1255 = vpow2.f32 %v685_v38 }
 0x15a   : > { %v1745_v54 = vpop.eup %1237  ;;  %1257 = vpow2.f32 %v687_v40  ;;  %v727_v58 = vadd.f32 %v1743_v48, %v1741_v44  ;;  %v1131_v60 = vpack.c.bf16 %v1743_v48, %v1741_v44 }
 0x15b   : > { %v1751_v62 = vpop.eup %1239  ;;  %1259 = vpow2.f32 %v689_v42 }
 0x15c   : > { %v1753_v3 = vpop.eup %1241  ;;  %1261 = vpow2.f32 %v691_v46  ;;  %v728_v33 = vadd.f32 %v1745_v54, %v727_v58  ;;  %v1135_v36 = vpack.c.bf16 %v1751_v62, %v1745_v54 }
 0x15d   : > { %v1758_v35 = vpop.eup %1243  ;;  %1263 = vpow2.f32 %v693_v50 }
 0x15e   : > { %v1760_v37 = vpop.eup %1245  ;;  %1265 = vpow2.f32 %v695_v56  ;;  %v729_v41 = vadd.f32 %v1751_v62, %v728_v33  ;;  %v1139_v47 = vpack.c.bf16 %v1758_v35, %v1753_v3 }
 0x15f   : > { %v1765_v45 = vpop.eup %1247  ;;  %1267 = vpow2.f32 %v697_v0 }
 0x160   : > { %v1770_v49 = vpop.eup %1249  ;;  %1269 = vpow2.f32 %v699_v34  ;;  %v730_v53 = vadd.f32 %v1753_v3, %v729_v41  ;;  %v1143_v13 = vpack.c.bf16 %v1765_v45, %v1760_v37 }
 0x161   : > { %v1778_v15 = vpop.eup %1251  ;;  %1271 = vpow2.f32 %v701_v39 }
 0x162   : > { %v1783_v59 = vpop.eup %1253  ;;  %1273 = vpow2.f32 %v703_v43  ;;  %v731_v57 = vadd.f32 %v1758_v35, %v730_v53  ;;  %v1147_v17 = vpack.c.bf16 %v1778_v15, %v1770_v49 }
 0x163   : > { %v1791_v19 = vpop.eup %1255  ;;  %1275 = vpow2.f32 %v705_v51 }
 0x164   : > { %v1796_v63 = vpop.eup %1257  ;;  %1277 = vpow2.f32 %v707_v55  ;;  %v732_v61 = vadd.f32 %v1760_v37, %v731_v57  ;;  %v1151_v21 = vpack.c.bf16 %v1791_v19, %v1783_v59 }
 0x165   : > { %v1804_v23 = vpop.eup %1259  ;;  %1279 = vpow2.f32 %v709_v8 }
 0x166   : > { %v1809_v5 = vpop.eup %1261  ;;  %1281 = vpow2.f32 %v711_v14  ;;  %v733_v4 = vadd.f32 %v1765_v45, %v732_v61  ;;  %v1155_v25 = vpack.c.bf16 %v1804_v23, %v1796_v63 }
 0x167   : > { %v1817_v27 = vpop.eup %1263  ;;  %1283 = vpow2.f32 %v713_v12 }
 0x168   : > { %v1266_v6 = vpop.eup %1265  ;;  %1285 = vpow2.f32 %v715_v18  ;;  %v734_v26 = vadd.f32 %v1770_v49, %v733_v4  ;;  %v1159_v7 = vpack.c.bf16 %v1817_v27, %v1809_v5 }
 0x169   : > { %v1268_v30 = vpop.eup %1267  ;;  %1287 = vpow2.f32 %v717_v16 }
 0x16a   : > { %v1270_v38 = vpop.eup %1269  ;;  %1289 = vpow2.f32 %v719_v22  ;;  %v735_v24 = vadd.f32 %v1778_v15, %v734_v26  ;;  %v1129_v9 = vpack.c.bf16 %v1268_v30, %v1266_v6 }
 0x16b   : > { %v1272_v40 = vpop.eup %1271  ;;  %1291 = vpow2.f32 %v721_v20 }
 0x16c   : > { %v1274_v31 = vpop.eup %1273  ;;  %1293 = vpow2.f32 %v723_v28  ;;  %v736_v10 = vadd.f32 %v1783_v59, %v735_v24  ;;  %1130 = vmatprep.subr.bf16.mxu1 %v1129_v9  ;;  %v1133_v42 = vpack.c.bf16 %v1272_v40, %v1270_v38 }
 0x16d   : > { %v1276_v46 = vpop.eup %1275  ;;  %1295 = vpow2.f32 %v725_v32  ;;  %1132 = vmatpush3.bf16.msra.mxu1 %v1131_v60 }
 0x16e   : > { %v1278_v29 = vpop.eup %1277  ;;  %v737_v52 = vadd.f32 %v1791_v19, %v736_v10  ;;  %1134 = vmatprep.subr.bf16.mxu1 %v1133_v42  ;;  %v1137_v11 = vpack.c.bf16 %v1276_v46, %v1274_v31 }
 0x16f   : > { %v1280_v50 = vpop.eup %1279 }
 0x170   : > { %v1282_v56 = vpop.eup %1281  ;;  %v738_v58 = vadd.f32 %v1796_v63, %v737_v52  ;;  %v1141_v0 = vpack.c.bf16 %v1280_v50, %v1278_v29 }
 0x171   : > { %v1284_v34 = vpop.eup %1283  ;;  %1136 = vmatpush3.bf16.msra.mxu1 %v1135_v36 }
 0x172   : > { %v1286_v33 = vpop.eup %1285  ;;  %v739_v39 = vadd.f32 %v1804_v23, %v738_v58  ;;  %1138 = vmatprep.subr.bf16.mxu1 %v1137_v11  ;;  %v1145_v44 = vpack.c.bf16 %v1284_v34, %v1282_v56 }
 0x173   : > { %v1288_v48 = vpop.eup %1287 }
 0x174   : > { %v1290_v60 = vpop.eup %1289  ;;  %v740_v43 = vadd.f32 %v1809_v5, %v739_v39  ;;  %v1149_v41 = vpack.c.bf16 %v1288_v48, %v1286_v33 }
 0x175   : > { %v1292_v51 = vpop.eup %1291  ;;  %1140 = vmatpush3.bf16.msra.mxu1 %v1139_v47 }
 0x176   : > { %v1294_v55 = vpop.eup %1293  ;;  %v741_v53 = vadd.f32 %v1817_v27, %v740_v43  ;;  %1142 = vmatprep.subr.bf16.mxu1 %v1141_v0  ;;  %v1153_v54 = vpack.c.bf16 %v1292_v51, %v1290_v60 }
 0x177   : > { %v1296_v62 = vpop.eup %1295 }
 0x178   : > { %v742_v36 = vadd.f32 %v1266_v6, %v741_v53  ;;  %v1157_v8 = vpack.c.bf16 %v1296_v62, %v1294_v55 }
 0x179   : > { %1144 = vmatpush3.bf16.msra.mxu1 %v1143_v13 }
 0x17a   : > { %v743_v14 = vadd.f32 %v1268_v30, %v742_v36  ;;  %1146 = vmatprep.subr.bf16.mxu1 %v1145_v44 }
 0x17c   : > { %v744_v57 = vadd.f32 %v1270_v38, %v743_v14 }
 0x17d   : > { %1148 = vmatpush3.bf16.msra.mxu1 %v1147_v17 }
 0x17e   : > { %v745_v3 = vadd.f32 %v1272_v40, %v744_v57  ;;  %1150 = vmatprep.subr.bf16.mxu1 %v1149_v41 }
 0x180   : > { %v746_v35 = vadd.f32 %v1274_v31, %v745_v3 }
 0x181   : > { %1152 = vmatpush3.bf16.msra.mxu1 %v1151_v21 }
 0x182   : > { %v747_v47 = vadd.f32 %v1276_v46, %v746_v35  ;;  %1154 = vmatprep.subr.bf16.mxu1 %v1153_v54 }
 0x184   : > { %v748_v12 = vadd.f32 %v1278_v29, %v747_v47 }
 0x185   : > { %1156 = vmatpush3.bf16.msra.mxu1 %v1155_v25 }
 0x186   : > { %v749_v37 = vadd.f32 %v1280_v50, %v748_v12  ;;  %1158 = vmatprep.subr.bf16.mxu1 %v1157_v8 }
 0x188   : > { %v750_v45 = vadd.f32 %v1282_v56, %v749_v37 }
 0x189   : > { %1160 = vmatpush3.bf16.msra.mxu1 %v1159_v7 }
 0x18a   : > { %v751_v49 = vadd.f32 %v1284_v34, %v750_v45 }
 0x18c   : > { %v752_v13 = vadd.f32 %v1286_v33, %v751_v49  ;;  %832 = vmatmul.mubr.f32.vlgmr.msra.gmra.mrb[0].mxu1 %v1629_v2 }
 0x18e   : > { %v753_v15 = vadd.f32 %v1288_v48, %v752_v13 }
 0x190   : > { %v754_v59 = vadd.f32 %v1290_v60, %v753_v15 }
 0x192   : > { %v755_v17 = vadd.f32 %v1292_v51, %v754_v59 }
 0x194   : > { %v756_v19 = vadd.f32 %v1294_v55, %v755_v17 }
 0x196   : > { %v757_v18 = vadd.f32 %v1296_v62, %v756_v19 }
 0x198   : > { %v758_v61 = vrot.slane %v757_v18, 4 }
 0x19a   : > { %v759_v21 = vadd.f32 %v758_v61, %v757_v18 }
 0x19c   : > { %v760_v63 = vrot.slane %v759_v21, 2 }
 0x19e   : > { %v761_v23 = vadd.f32 %v760_v63, %v759_v21 }
 0x1a0   : > { %v762_v16 = vrot.slane %v761_v23, 1 }
 0x1a2   : > { %v763_v5 = vadd.f32 %v762_v16, %v761_v23 }
 0x1a4   : > { %1297 = vrcp.f32 %v763_v5 }
 0x1ae   : > { %v1298_v25 = vpop.eup %1297 }
 0x25f   : > { %v1076_v22 = vpop.f32.mrb[0].mxu1 }
 0x260   : > { %v1077_v2 = vpop.f32.mrb[1].mxu1 }
 0x261   : > { %v1078_v4 = vadd.f32 %v1077_v2, %v1076_v22 }
 0x263   : > { %v838_v27 = vmul.f32 %v1298_v25, %v1078_v4 }
 0x265   : > { %v839_v20 = vadd.f32 %v838_v27, %v1505_v1 }
 0x267   : > { %840 = vst [vmem:[%s215_s11] sm:$0xf] %v839_v20 }
 0x268   : > { %1312 = shalt.err (!%p1309_p7)
}
 0x269   : > { %s1313_s6 = scalar_lea.hbm %s1867_s27, 64  ;;  %s1317_s8 = scalar_lea.hbm %s1923_s3, 256 }
 0x26a   : > { %p1314_p9 = scmp.ne.s32.totalorder %s1867_s27, %s1313_s6  ;;  %p1318_p12 = scmp.lt.u32.totalorder %s1867_s27, %s1923_s3 }
 0x26b   : > { %p1319_p13 = scmp.lt.u32.totalorder %s1317_s8, %s1313_s6  ;;  %p1321_p1 = scmp.lt.u32.totalorder %s1313_s6, %s1867_s27 }
 0x26c   : > { %p1315_p10 = pnand %p1314_p9, %p1467_p3 }
 0x26d   : > { %p1320_p0 = por %p1319_p13, %p1318_p12 }
 0x26e   : > { %p1316_p11 = pneg %p1315_p10 }
 0x26f   : > { %p1322_p2 = por %p1321_p1, %p1320_p0 }
 0x271   : > { %p1323_p4 = pnand %p1322_p2, %p1316_p11 }
 0x273   : > { %1326 = shalt.err (!%p1323_p4)
}
 0x274   : > { %1161 = dma.vmem_to_hbm [thread:$0]  (%p1467_p3), %s1869_s20, 64, %s1867_s27, %s842_s15  }
 0x275 PF: > { %p1167_p5 = scmp.ge.s32.totalorder %s1393_s19, 2  ;;  %s869_s11 = sand.u32 1, %s1365_s12  }
 0x276   : > { %s870_s21 = scalar_lea.sflag [#allocation3], %s869_s11 }
 0x277   : > { %p1164_p6 = pnand %p1167_p5, %p1476_p8 }
 0x279   : > { %1360 = dma.done.wait (!%p1164_p6), %s870_s21, 64  }
 0x27a   : > { %1362 = vsyncadd (!%p1164_p6), %s870_s21, 4294967232  ;;  %s16_s19 = sadd.s32 1, %s1393_s19   ;;  %s1926_s12 = smov %s1369_s13 }
 0x27b   : > { %p13_p7 = scmp.ge.s32.totalorder %s16_s19, 6   ;;  %s1927_s13 = smov %s1373_s14 }
 0x27c   : > { %s1928_s14 = smov %s1485_s30  ;;  %s1929_s15 = smov %s1385_s17 }
 0x27d   : > { %s1930_s16 = smov %s1389_s18  ;;  %s1931_s17 = smov %s1934_s22 }
 0x27e   : > { %s1932_s18 = smov %s1938_s23  ;;  %15 = sbr.rel (!%p13_p7) target bundleno = 5 (0x5), region = 73 }
 0x285   :  { %875 = vsyncpa [#allocation3], 1 }
 0x286   :  { %877 = vsyncpa [#allocation3 + $0x1], 1 }

</bundles_post_ra>
